<compile_context>
chip_gen: v6e
topology: v6e:2x2x1
jax: 0.10.0
libtpu: 0.0.40
codegen_flags: <defaults>
</compile_context>

<pallas_src>
import functools

import jax
import jax.numpy as jnp
from jax.experimental import pallas as pl
from jax.experimental.pallas import tpu as pltpu


def _rmsnorm_kernel(x_ref, w_ref, o_ref, *, eps):
    # x_ref: (tm, H) tile of flattened tokens; w_ref: (1, H) resident weight.
    x = x_ref[...].astype(jnp.float32)
    var = jnp.mean(x * x, axis=-1, keepdims=True)        # lane reduction (XLU)
    inv = jax.lax.rsqrt(var + eps)                       # EUP; free vs mem-bound
    normed = (x * inv).astype(o_ref.dtype)               # cast back to input dtype
    o_ref[...] = w_ref[...].astype(o_ref.dtype) * normed


def _round_up(n, m):
    return ((n + m - 1) // m) * m


@functools.partial(jax.jit, static_argnames=("eps", "tm"))
def llama_rmsnorm(x, weight, *, eps=1e-6, tm=512):
    """x: (..., H); weight: (H,). Returns array with same shape/dtype as x."""
    orig_shape = x.shape
    H = orig_shape[-1]
    M = 1
    for d in orig_shape[:-1]:
        M *= d
    x2 = x.reshape(M, H)

    # Row tile: large to amortize per-grid-step overhead (~0.35 us) and keep
    # stores lane-dense; multiple of 8 sublanes; no larger than padded M.
    tm_eff = min(tm, _round_up(M, 8))
    tm_eff = _round_up(tm_eff, 8)
    Mp = _round_up(M, tm_eff)
    if Mp != M:
        # Zero padding rows are harmless: rsqrt(0 + eps) * 0 = 0, then sliced off.
        x2 = jnp.pad(x2, ((0, Mp - M), (0, 0)))

    w2 = weight.reshape(1, H)

    itemsize = jnp.dtype(x.dtype).itemsize
    cost = pl.CostEstimate(
        flops=4 * Mp * H,                         # square, reduce-add, scale, weight mul
        transcendentals=Mp,                       # one rsqrt per row
        bytes_accessed=2 * Mp * H * itemsize + H * jnp.dtype(weight.dtype).itemsize,
    )

    out2 = pl.pallas_call(
        functools.partial(_rmsnorm_kernel, eps=eps),
        out_shape=jax.ShapeDtypeStruct((Mp, H), x.dtype),
        grid_spec=pltpu.PrefetchScalarGridSpec(
            num_scalar_prefetch=0,
            grid=(Mp // tm_eff,),
            in_specs=[
                pl.BlockSpec((tm_eff, H), lambda i: (i, 0)),   # activation tile
                pl.BlockSpec((1, H), lambda i: (0, 0)),        # weight (tiny, resident)
            ],
            out_specs=pl.BlockSpec((tm_eff, H), lambda i: (i, 0)),
        ),
        compiler_params=pltpu.CompilerParams(
            dimension_semantics=("parallel",)),                # megacore sharding
        cost_estimate=cost,
    )(x2, w2)

    if Mp != M:
        out2 = out2[:M]
    return out2.reshape(orig_shape)


def _reference(x, weight, eps=1e-6):
    xf = x.astype(jnp.float32)
    var = jnp.mean(xf * xf, axis=-1, keepdims=True)
    xn = xf * jax.lax.rsqrt(var + eps)
    return weight * xn.astype(x.dtype)


if __name__ == "__main__":
    # Small config consistent with the module: batch=2, seq=8, hidden=32.
    B, S, H = 2, 8, 32
    eps = 1e-6

    key = jax.random.PRNGKey(0)
    kx, kw = jax.random.split(key, 2)

    x = jax.random.normal(kx, (B, S, H), dtype=jnp.float32)
    weight = 1.0 + 0.05 * jax.random.normal(kw, (H,), dtype=jnp.float32)

    out = llama_rmsnorm(x, weight, eps=eps, tm=512)
    jax.block_until_ready(out)

    ref = _reference(x, weight, eps=eps)
    assert out.shape == (B, S, H)
    assert out.dtype == x.dtype
    assert jnp.allclose(out, ref, atol=1e-5, rtol=1e-5), "mismatch vs reference"

    print("KERNEL_OK")
</pallas_src>

<mosaic_0001>
module attributes {stable_mosaic.version = 11 : i64} {
  func.func @_rmsnorm_kernel(%arg0: i32, %arg1: memref<16x32xf32, #tpu.memory_space<vmem>>, %arg2: memref<1x32xf32, #tpu.memory_space<vmem>>, %arg3: memref<16x32xf32, #tpu.memory_space<vmem>>) attributes {dimension_semantics = [#tpu.dimension_semantics<parallel>], iteration_bounds = array<i64: 1>, scalar_prefetch = 0 : i64, scratch_operands = 0 : i64, tpu.core_type = #tpu.core_type<tc>, window_params = [{transform_indices = @transform_0, window_bounds = array<i64: 16, 32>}, {pipeline_mode = #tpu.pipeline_mode<synchronous>, transform_indices = @transform_1, window_bounds = array<i64: 1, 32>}, {transform_indices = @transform_2, window_bounds = array<i64: 16, 32>}]} {
    %c0 = arith.constant 0 : index
    %c0_0 = arith.constant 0 : index
    %0 = vector.load %arg1[%c0, %c0_0] : memref<16x32xf32, #tpu.memory_space<vmem>>, vector<16x32xf32>
    %1 = arith.mulf %0, %0 : vector<16x32xf32>
    %cst = arith.constant dense<0.000000e+00> : vector<16xf32>
    %2 = vector.multi_reduction <add>, %1, %cst [1] : vector<16x32xf32> to vector<16xf32>
    %3 = vector.shape_cast %2 : vector<16xf32> to vector<16x1xf32>
    %cst_1 = arith.constant 3.200000e+01 : f32
    %4 = vector.broadcast %cst_1 : f32 to vector<16x1xf32>
    %5 = arith.divf %3, %4 : vector<16x1xf32>
    %cst_2 = arith.constant 9.99999997E-7 : f32
    %6 = vector.broadcast %cst_2 : f32 to vector<16x1xf32>
    %7 = arith.addf %5, %6 : vector<16x1xf32>
    %8 = math.rsqrt %7 : vector<16x1xf32>
    %9 = vector.broadcast %8 : vector<16x1xf32> to vector<16x32xf32>
    %10 = arith.mulf %0, %9 : vector<16x32xf32>
    %c0_3 = arith.constant 0 : index
    %c0_4 = arith.constant 0 : index
    %11 = vector.load %arg2[%c0_3, %c0_4] : memref<1x32xf32, #tpu.memory_space<vmem>>, vector<1x32xf32>
    %12 = vector.broadcast %11 : vector<1x32xf32> to vector<16x32xf32>
    %13 = arith.mulf %12, %10 : vector<16x32xf32>
    %c0_5 = arith.constant 0 : index
    %c0_6 = arith.constant 0 : index
    %14 = vector.load %arg3[%c0_5, %c0_6] : memref<16x32xf32, #tpu.memory_space<vmem>>, vector<16x32xf32>
    tpu.vector_store %arg3[%c0_5, %c0_6], %13 {strides = array<i32>} : memref<16x32xf32, #tpu.memory_space<vmem>>, vector<16x32xf32>,
    return
  }
  func.func @transform_0(%arg0: i32) -> (i32, i32) {
    %c0_i32 = arith.constant 0 : i32
    %c0_i32_0 = arith.constant 0 : i32
    return %arg0, %c0_i32 : i32, i32
  }
  func.func @transform_1(%arg0: i32) -> (i32, i32) {
    %c0_i32 = arith.constant 0 : i32
    %c0_i32_0 = arith.constant 0 : i32
    %c0_i32_1 = arith.constant 0 : i32
    return %c0_i32, %c0_i32_0 : i32, i32
  }
  func.func @transform_2(%arg0: i32) -> (i32, i32) {
    %c0_i32 = arith.constant 0 : i32
    %c0_i32_0 = arith.constant 0 : i32
    return %arg0, %c0_i32 : i32, i32
  }
}

</mosaic_0001>

<bundles_post_ra>
// kernel: llama_rmsnorm.1
= control target key start
LH: loop header
LB: loop body
LE: loop exit
PB: predicated region body
PF: predicated region fallthrough
CT: control target
= control target key end

     0   :  { %7 = vsyncpa [#allocation3], 0  ;;  %s165_s0 = inlined_call_operand.hbm [shape: f32[16,32], index: 0, kind: input, shape index: {}]   ;;  %s166_s1 = inlined_call_operand.vmem [shape: f32[1,32], index: 1, kind: input, shape index: {}]   ;;  %s167_s2 = inlined_call_operand.hbm [shape: f32[16,32], index: 2, kind: output, shape index: {}]  }
   0x1   :  { %8 = vsyncpa [#allocation4], 0  ;;  %s127_s9 = smov [#allocation2]  }
   0x2   :  { %s14_s10 = sshll.u32 %s127_s9, 4  ;;  %s15_s10 = int_to_ptr.vmem [resolvable:$true] %s14_s10 }
   0x3   :  { %s91_s11 = scalar_lea.vmem %s15_s10, 256  ;;  %p96_p1 = scmp.lt.s32.totalorder %s15_s10, %s15_s10 }
   0x4   :  { %p92_p0 = scmp.ne.s32.totalorder %s15_s10, %s91_s11  ;;  %p97_p2 = scmp.lt.s32.totalorder %s91_s11, %s91_s11 }
   0x6   :  { %p98_p3 = por %p97_p2, %p96_p1 }
   0x8   :  { %p99_p4 = pnand %p98_p3, %p92_p0 }
   0xa   :  { %102 = shalt.err (!%p99_p4)
}
   0xb   :  { %s128_s12 = smov 128   ;;  %s129_s13 = smov 8  }
   0xc   :  { %20 = dma.hbm_to_vmem [thread:$0]  %s165_s0, 256, %s15_s10, [#allocation3], %s128_s12, %s128_s12, %s129_s13  }
   0xd   :  { %123 = dma.done.wait [#allocation3], 256  }
   0xe   :  { %124 = vsyncadd [#allocation3], 4294967040  ;;  %v26_v0 = vld [vmem:[#allocation2] sm:$0xff]  ;;  %vm30_vm0 = vcmask 261120   ;;  %v27_v1 = vld [vmem:[#allocation2 + $0x8] sm:$0xff]  ;;  %s130_s17 = smov [#allocation5]  }
   0xf   :  { %v28_v2 = vmul.f32 %v26_v0, %v26_v0  ;;  %v29_v3 = vmul.f32 %v27_v1, %v27_v1  ;;  %v74_v13 = vld [vmem:[%s166_s1] ss:$0 sm:$0xff]  ;;  %s62_s18 = sshll.u32 %s130_s17, 4  ;;  %s63_s18 = int_to_ptr.vmem [resolvable:$true] %s62_s18 }
  0x10   :  { %s103_s19 = scalar_lea.vmem %s63_s18, 256  ;;  %p108_p6 = scmp.lt.s32.totalorder %s63_s18, %s63_s18 }
  0x11   :  { %v31_v4 = vsel %vm30_vm0, %v28_v2, 0.0  ;;  %v34_v5 = vsel %vm30_vm0, %v29_v3, 0.0  ;;  %p104_p5 = scmp.ne.s32.totalorder %s63_s18, %s103_s19  ;;  %p109_p7 = scmp.lt.s32.totalorder %s103_s19, %s103_s19 }
  0x12   :  { %32 = vadd.xlane.f32.xlu0 %v31_v4 }
  0x13   :  { %p110_p8 = por %p109_p7, %p108_p6 }
  0x15   :  { %p111_p9 = pnand %p110_p8, %p104_p5 }
  0x16   :  { %35 = vadd.xlane.f32.xlu0 %v34_v5 }
  0x9b   :  { %v33_v6 = vpop.xlane.xlu0 %32 }
  0x9c   :  { %v38_v7 = vmul.f32 0.03125, %v33_v6 }
  0x9e   :  { %v40_v8 = vadd.f32 1e-06, %v38_v7 }
  0x9f   :  { %v36_v9 = vpop.xlane.xlu0 %35 }
  0xa0   :  { %79 = vrsqrt.f32 %v40_v8  ;;  %v39_v10 = vmul.f32 0.03125, %v36_v9 }
  0xa2   :  { %v41_v11 = vadd.f32 1e-06, %v39_v10 }
  0xa4   :  { %81 = vrsqrt.f32 %v41_v11 }
  0xad   :  { %v80_v12 = vpop.eup %79 }
  0xae   :  { %v44_v14 = vmul.f32 %v80_v12, %v26_v0 }
  0xb0   :  { %v53_v15 = vmul.f32 %v74_v13, %v44_v14 }
  0xb1   :  { %v82_v16 = vpop.eup %81 }
  0xb2   :  { %v45_v17 = vmul.f32 %v82_v16, %v27_v1  ;;  %55 = vst.msk [vmem:[#allocation5] sm:$0xff] %vm30_vm0, %v53_v15 }
  0xb4   :  { %v54_v18 = vmul.f32 %v74_v13, %v45_v17 }
  0xb6   :  { %56 = vst.msk [vmem:[#allocation5 + $0x8] sm:$0xff] %vm30_vm0, %v54_v18 }
  0xb7   :  { %114 = shalt.err (!%p111_p9)
}
  0xb8   :  { %68 = dma.vmem_to_hbm [thread:$0]  %s63_s18, 256, %s167_s2, [#allocation4], %s128_s12, %s128_s12, %s129_s13  }
  0xb9   :  { %125 = dma.done.wait [#allocation4], 256  }
  0xba   :  { %126 = vsyncadd [#allocation4], 4294967040 }
  0xbb   :  { %72 = vsyncpa [#allocation3], 1 }
  0xbc   :  { %73 = vsyncpa [#allocation4], 1 }

</bundles_post_ra>
